<compile_context>
chip_gen: v5e
topology: v5e:2x2
jax: 0.10.0
libtpu: 0.0.40
codegen_flags: <defaults>
</compile_context>

<pallas_src>
import math

import jax
import jax.numpy as jnp
from jax.experimental import pallas as pl
from jax.experimental.pallas import tpu as pltpu

_LANE = 128
_DEFAULT_BLOCK_BYTES = 2 << 20               # ~2 MiB per stream per buffer
_DEFAULT_MIN_PALLAS_SAMPLE_BYTES = 1 << 18   # below this, per-step overhead dominates


def _mixup_x_kernel(perm_ref, coeffs_ref, x_ref, xp_ref, xo_ref):
    # perm_ref / coeffs_ref are scalar-prefetch SMEM refs; read the scalar
    # coefficient once, before any VMEM traffic.
    del perm_ref
    i = pl.program_id(0)
    c = coeffs_ref[i]                        # f32 scalar from SMEM
    dt = xo_ref.dtype
    c_d = c.astype(dt)
    cm_d = (1.0 - c).astype(dt)
    # Native-dtype math (bf16 VALU on v6e/v7x); HBM-bound, so VPU work is free.
    xo_ref[...] = (x_ref[...] * c_d + xp_ref[...] * cm_d).astype(dt)


def _choose_rows_per_block(rows, itemsize, batch, block_bytes):
    """Sublanes per block from a per-stream byte budget (multiple of 8)."""
    r_budget = max(8, (int(block_bytes) // (_LANE * itemsize)) // 8 * 8)
    r = min(rows, r_budget)
    if batch == 1 and rows >= 16:
        # v7x: 2 TensorCores share ~3.2 TB/s HBM; make sure the grid has >= 2
        # reasonably balanced steps so both cores stream.
        half = ((rows + 1) // 2 + 7) // 8 * 8
        r = min(r, half)
    if r < rows:
        r = max(8, (r // 8) * 8)   # non-full blocks must be a multiple of 8 sublanes
    return r


def _mix_labels(Y, perm, coeffs, mixadd):
    # Tiny (B x n_classes): plain JAX, no reason to pollute the streaming kernel.
    # TODO(synk): Y must already be float soft labels (the PyTorch module
    # assumes the same); integer labels would need a one-hot first.
    if mixadd:
        return jnp.clip(Y + Y[perm], 0.0, 1.0)
    if Y.ndim == 1:
        return coeffs * Y + (1.0 - coeffs) * Y[perm]
    c2 = coeffs.reshape((-1,) + (1,) * (Y.ndim - 1))
    return c2 * Y + (1.0 - c2) * Y[perm]


def _mixup_x_jax(X, perm, coeffs):
    c = coeffs.reshape((-1,) + (1,) * (X.ndim - 1)).astype(jnp.float32)
    xf = X.astype(jnp.float32)
    return (c * xf + (1.0 - c) * xf[perm]).astype(X.dtype)


def mixup_pallas(X, Y, perm, coeffs, *, mixadd: bool = False,
                 block_bytes_per_stream: int = _DEFAULT_BLOCK_BYTES,
                 min_pallas_sample_bytes: int = _DEFAULT_MIN_PALLAS_SAMPLE_BYTES):
    """Pallas implementation of Mixup.forward given perm + beta coeffs.

    X: (B, ...) float tensor (ndim >= 2, any float dtype).
    Y: (B,) or (B, n_classes) float (soft) labels.
    """
    orig_shape = X.shape
    orig_dtype = X.dtype
    B = X.shape[0]
    D = math.prod(X.shape[1:]) if X.ndim > 1 else 1
    itemsize = jnp.dtype(orig_dtype).itemsize

    # Validate perm so a bad index can never trigger an OOB HBM DMA.
    perm = jnp.clip(perm.astype(jnp.int32), 0, B - 1)
    coeffs = coeffs.astype(jnp.float32)

    use_pallas = (
        X.ndim >= 2
        and D > 0
        and D % _LANE == 0                              # zero-cost lane-dense reshape
        and D * itemsize >= min_pallas_sample_bytes     # tiny D: overhead dominates
        and jnp.issubdtype(orig_dtype, jnp.floating)
    )
    # TODO(synk): D % 128 != 0 could be handled with a masked in-kernel tail
    # store instead of this fallback; plain JAX is already the minimum 3 HBM
    # passes (XLA-fused), so the win would be small.
    if not use_pallas:
        return _mixup_x_jax(X, perm, coeffs), _mix_labels(Y, perm, coeffs, mixadd)

    # --- lane/sublane-dense slab: (B, rows, 128), zero-cost reshape ----------
    rows = D // _LANE
    R = _choose_rows_per_block(rows, itemsize, B, block_bytes_per_stream)
    grid_d = pl.cdiv(rows, R)
    X3 = X.reshape(B, rows, _LANE)

    block_bytes = R * _LANE * itemsize
    # 3 streams (x, x[perm], out) x 2 pipeline buffers + headroom; capped at
    # 48 MiB so v7x (64 MiB physical VMEM) keeps its 2-deep pipeline intact.
    vmem_limit = int(min(48 << 20, max(24 << 20, 3 * 2 * block_bytes + (8 << 20))))

    grid_spec = pltpu.PrefetchScalarGridSpec(
        num_scalar_prefetch=2,                 # perm, coeffs -> SMEM
        grid=(B, grid_d),
        in_specs=[
            # X[i], tile j
            pl.BlockSpec((1, R, _LANE), lambda i, j, perm, coeffs: (i, j, 0)),
            # X[perm[i]], tile j (data-dependent gather via scalar prefetch).
            # NOTE: pipeline_mode=pl.Buffered(3) here could hide the gather's
            # HBM-jump latency, but only if a trace shows exposed DMA, so it
            # is left at the default depth.
            pl.BlockSpec((1, R, _LANE), lambda i, j, perm, coeffs: (perm[i], j, 0)),
        ],
        out_specs=pl.BlockSpec((1, R, _LANE), lambda i, j, perm, coeffs: (i, j, 0)),
    )

    x_out = pl.pallas_call(
        _mixup_x_kernel,
        grid_spec=grid_spec,
        out_shape=jax.ShapeDtypeStruct((B, rows, _LANE), orig_dtype),
        compiler_params=pltpu.CompilerParams(
            dimension_semantics=("parallel", "parallel"),
            vmem_limit_bytes=vmem_limit),
        cost_estimate=pl.CostEstimate(
            flops=3 * B * D,
            transcendentals=0,
            bytes_accessed=3 * B * D * itemsize),
    )(perm, coeffs, X3, X3)

    x_out = x_out.reshape(orig_shape)
    y_out = _mix_labels(Y, perm, coeffs, mixadd)
    return x_out, y_out


def mixup_reference(X, Y, perm, coeffs, *, mixadd: bool = False):
    """Pure-JAX (f32) reference mirroring the PyTorch forward."""
    c = coeffs.reshape((-1,) + (1,) * (X.ndim - 1)).astype(jnp.float32)
    xf = X.astype(jnp.float32)
    Xm = c * xf + (1.0 - c) * xf[perm]
    if mixadd:
        Ym = jnp.clip(Y + Y[perm], 0.0, 1.0)
    elif Y.ndim == 1:
        Ym = coeffs * Y + (1.0 - coeffs) * Y[perm]
    else:
        c2 = coeffs.reshape((-1,) + (1,) * (Y.ndim - 1))
        Ym = c2 * Y + (1.0 - c2) * Y[perm]
    return Xm, Ym


if __name__ == "__main__":
    mix_beta = 1.0

    key = jax.random.PRNGKey(0)
    kx, ky, kperm, kbeta = jax.random.split(key, 4)

    B, C, H, W = 2, 4, 16, 16          # D = C*H*W = 1024 (lane-dense, 8 rows)
    n_classes = 8

    X = jax.random.normal(kx, (B, C, H, W), dtype=jnp.float32)
    Y = jax.random.uniform(ky, (B, n_classes), dtype=jnp.float32)

    # randperm + Beta(mix_beta, mix_beta).rsample((B,)) -- randomness as glue.
    perm = jax.random.permutation(kperm, B).astype(jnp.int32)
    coeffs = jax.random.beta(kbeta, mix_beta, mix_beta, (B,)).astype(jnp.float32)

    # 1) f32, Pallas path (force past the small-D fallback for the demo shape)
    x_mix, y_mix = mixup_pallas(X, Y, perm, coeffs, mixadd=False,
                                min_pallas_sample_bytes=0)
    jax.block_until_ready((x_mix, y_mix))
    x_ref, y_ref = mixup_reference(X, Y, perm, coeffs, mixadd=False)
    assert x_mix.dtype == X.dtype and x_mix.shape == X.shape
    assert jnp.allclose(x_mix, x_ref, atol=1e-5, rtol=1e-5)
    assert jnp.allclose(y_mix, y_ref, atol=1e-5, rtol=1e-5)

    # 2) f32, multi-block grid with a ragged rows boundary (rows=12, R=8)
    X2 = jax.random.normal(kx, (B, 4, 24, 16), dtype=jnp.float32)
    x2_mix, y2_mix = mixup_pallas(X2, Y, perm, coeffs, mixadd=False,
                                  min_pallas_sample_bytes=0,
                                  block_bytes_per_stream=8 * _LANE * 4)
    jax.block_until_ready((x2_mix, y2_mix))
    x2_ref, y2_ref = mixup_reference(X2, Y, perm, coeffs, mixadd=False)
    assert jnp.allclose(x2_mix, x2_ref, atol=1e-5, rtol=1e-5)
    assert jnp.allclose(y2_mix, y2_ref, atol=1e-5, rtol=1e-5)

    # 3) bf16 (native-dtype in-kernel math) + mixadd branch
    Xb = X.astype(jnp.bfloat16)
    xb_mix, yb_mix = mixup_pallas(Xb, Y, perm, coeffs, mixadd=True,
                                  min_pallas_sample_bytes=0)
    jax.block_until_ready((xb_mix, yb_mix))
    xb_ref, yb_ref = mixup_reference(Xb, Y, perm, coeffs, mixadd=True)
    assert xb_mix.dtype == jnp.bfloat16 and xb_mix.shape == Xb.shape
    assert jnp.allclose(xb_mix.astype(jnp.float32), xb_ref, atol=5e-2, rtol=5e-2)
    assert jnp.allclose(yb_mix, yb_ref, atol=1e-5, rtol=1e-5)

    # 4) ragged D (not a multiple of 128) + 1-D labels -> automatic JAX fallback
    Xr = jax.random.normal(kx, (B, 3, 10, 10), dtype=jnp.float32)   # D = 300
    Yr = jax.random.uniform(ky, (B,), dtype=jnp.float32)
    xr_mix, yr_mix = mixup_pallas(Xr, Yr, perm, coeffs, mixadd=False)
    jax.block_until_ready((xr_mix, yr_mix))
    xr_ref, yr_ref = mixup_reference(Xr, Yr, perm, coeffs, mixadd=False)
    assert jnp.allclose(xr_mix, xr_ref, atol=1e-5, rtol=1e-5)
    assert jnp.allclose(yr_mix, yr_ref, atol=1e-5, rtol=1e-5)

    print("KERNEL_OK")
</pallas_src>

<mosaic_0001>
module attributes {stable_mosaic.version = 11 : i64} {
  func.func @_mixup_x_kernel(%arg0: i32, %arg1: i32, %arg2: memref<2xi32, #tpu.memory_space<smem>>, %arg3: memref<2xf32, #tpu.memory_space<smem>>, %arg4: memref<1x8x128xf32, #tpu.memory_space<vmem>>, %arg5: memref<1x8x128xf32, #tpu.memory_space<vmem>>, %arg6: memref<1x8x128xf32, #tpu.memory_space<vmem>>) attributes {dimension_semantics = [#tpu.dimension_semantics<parallel>, #tpu.dimension_semantics<parallel>], iteration_bounds = array<i64: 2, 1>, scalar_prefetch = 2 : i64, scratch_operands = 0 : i64, tpu.core_type = #tpu.core_type<tc>, window_params = [{transform_indices = @transform_0, window_bounds = array<i64: 1, 8, 128>}, {transform_indices = @transform_1, window_bounds = array<i64: 1, 8, 128>}, {transform_indices = @transform_2, window_bounds = array<i64: 1, 8, 128>}]} {
    %0 = arith.index_cast %arg0 : i32 to index
    %1 = memref.load %arg3[%0] : memref<2xf32, #tpu.memory_space<smem>>
    %cst = arith.constant 1.000000e+00 : f32
    %2 = arith.subf %cst, %1 : f32
    %c0 = arith.constant 0 : index
    %c0_0 = arith.constant 0 : index
    %c0_1 = arith.constant 0 : index
    %3 = vector.load %arg4[%c0, %c0_0, %c0_1] : memref<1x8x128xf32, #tpu.memory_space<vmem>>, vector<1x8x128xf32>
    %4 = vector.broadcast %1 : f32 to vector<1x8x128xf32>
    %5 = arith.mulf %3, %4 : vector<1x8x128xf32>
    %c0_2 = arith.constant 0 : index
    %c0_3 = arith.constant 0 : index
    %c0_4 = arith.constant 0 : index
    %6 = vector.load %arg5[%c0_2, %c0_3, %c0_4] : memref<1x8x128xf32, #tpu.memory_space<vmem>>, vector<1x8x128xf32>
    %7 = vector.broadcast %2 : f32 to vector<1x8x128xf32>
    %8 = arith.mulf %6, %7 : vector<1x8x128xf32>
    %9 = arith.addf %5, %8 : vector<1x8x128xf32>
    %c0_5 = arith.constant 0 : index
    %c0_6 = arith.constant 0 : index
    %c0_7 = arith.constant 0 : index
    %10 = vector.load %arg6[%c0_5, %c0_6, %c0_7] : memref<1x8x128xf32, #tpu.memory_space<vmem>>, vector<1x8x128xf32>
    tpu.vector_store %arg6[%c0_5, %c0_6, %c0_7], %9 {strides = array<i32>} : memref<1x8x128xf32, #tpu.memory_space<vmem>>, vector<1x8x128xf32>,
    return
  }
  func.func @transform_0(%arg0: i32, %arg1: i32, %arg2: memref<2xi32, #tpu.memory_space<smem>>, %arg3: memref<2xf32, #tpu.memory_space<smem>>) -> (i32, i32, i32) {
    %c0_i32 = arith.constant 0 : i32
    %c0_i32_0 = arith.constant 0 : i32
    return %arg0, %arg1, %c0_i32 : i32, i32, i32
  }
  func.func @transform_1(%arg0: i32, %arg1: i32, %arg2: memref<2xi32, #tpu.memory_space<smem>>, %arg3: memref<2xf32, #tpu.memory_space<smem>>) -> (i32, i32, i32) {
    %0 = arith.index_cast %arg0 : i32 to index
    %1 = memref.load %arg2[%0] : memref<2xi32, #tpu.memory_space<smem>>
    %c0_i32 = arith.constant 0 : i32
    %c0_i32_0 = arith.constant 0 : i32
    return %1, %arg1, %c0_i32 : i32, i32, i32
  }
  func.func @transform_2(%arg0: i32, %arg1: i32, %arg2: memref<2xi32, #tpu.memory_space<smem>>, %arg3: memref<2xf32, #tpu.memory_space<smem>>) -> (i32, i32, i32) {
    %c0_i32 = arith.constant 0 : i32
    %c0_i32_0 = arith.constant 0 : i32
    return %arg0, %arg1, %c0_i32 : i32, i32, i32
  }
}

</mosaic_0001>

<bundles_post_ra>
// kernel: tpu_custom_call.1
= control target key start
LH: loop header
LB: loop body
LE: loop exit
PB: predicated region body
PF: predicated region fallthrough
CT: control target
= control target key end

     0   :  { %s681_s21 = smov [#allocation3]   ;;  %s682_s22 = smov [#allocation4]   ;;  %s935_s0 = inlined_call_operand.hbm [shape: s32[2], index: 0, kind: input, shape index: {}]   ;;  %s936_s2 = inlined_call_operand.hbm [shape: f32[2,8,128], index: 2, kind: input, shape index: {}]   ;;  %s937_s3 = inlined_call_operand.hbm [shape: f32[2,8,128], index: 3, kind: input, shape index: {}]   ;;  %s938_s4 = inlined_call_operand.hbm [shape: f32[2,8,128], index: 4, kind: output, shape index: {}]   ;;  %s939_s1 = inlined_call_operand.hbm [shape: f32[2], index: 1, kind: input, shape index: {}]  }
   0x1   :  { %943 = sst [smem:[#allocation20_spill]] %s936_s2  ;;  %s10_s17 = sshll.u32 %s935_s0, 4  ;;  %s11_s17 = int_to_ptr.hbm [resolvable:$true] %s10_s17 }
   0x2   :  { %s15_s20 = sshll.u32 %s939_s1, 4  ;;  %s16_s20 = int_to_ptr.hbm [resolvable:$true] %s15_s20 }
   0x3   :  { %13 = dma.hbm_to_smem %s11_s17, 16, %s681_s21, [#allocation2] }
   0x4   :  { %18 = dma.hbm_to_smem %s16_s20, 16, %s682_s22, [#allocation2] }
   0x5   :  { %631 = dma.done.wait [#allocation2], 32 }
   0x6   :  { %632 = vsyncadd [#allocation2], 4294967264 }
   0x7   :  { %21 = sfence }
   0x8   :  { %22 = vsyncpa [#allocation6], 0 }
   0x9   :  { %24 = vsyncpa [#allocation6 + $0x1], 0 }
   0xa   :  { %25 = vsyncpa [#allocation9], 0 }
   0xb   :  { %27 = vsyncpa [#allocation9 + $0x1], 0 }
   0xc   :  { %28 = vsyncpa [#allocation7], 0 }
   0xd   :  { %30 = vsyncpa [#allocation7 + $0x1], 0  ;;  %s714_s0 = smov 0   ;;  %s716_s23 = smov 0  }
   0xe   :  { %s718_s1 = smov 0   ;;  %s720_s24 = smov 0  }
   0xf   :  { %s722_s25 = smov 0   ;;  %s724_s26 = smov 0  }
  0x10   :  { %s726_s27 = smov 0   ;;  %s728_s28 = smov 0  }
  0x11   :  { %s730_s29 = smov 0  }
  0x12 LB: > { %944 = sst [smem:[#allocation17_spill]] %s675_s28  ;;  %s370_s30 = sadd.s32 4294967295, %s679_s29   ;;  %s679_s29 = sphi %s730_s29, %s36_s29   ;;  %s675_s28 = sphi %s728_s28, %s962_s28   ;;  %s671_s27 = sphi %s726_s27, %s961_s27   ;;  %s667_s26 = sphi %s724_s26, %s968_s26   ;;  %s663_s25 = sphi %s722_s25, %s967_s25   ;;  %s659_s24 = sphi %s720_s24, %s966_s24   ;;  %s655_s1 = sphi %s718_s1, %s965_s1   ;;  %s651_s23 = sphi %s716_s23, %s964_s23   ;;  %s647_s0 = sphi %s714_s0, %s963_s0  }
  0x13   : > { %s371_s5 = sadd.s32 4294967294, %s679_s29   ;;  %s48_s6 = sadd.s32 1, %s675_s28 }
  0x14   : > { %s57_s7 = sadd.s32 1, %s667_s26  ;;  %p50_p0 = scmp.ge.s32.totalorder %s48_s6, 2 }
  0x15   : > { %p64_p1 = scmp.ne.s32.totalorder %s667_s26, %s663_s25  ;;  %p65_p2 = scmp.eq.s32.totalorder %s679_s29, 0 }
  0x16   : > { %p70_p3 = scmp.ne.s32.totalorder %s663_s25, %s659_s24  ;;  %s970_s6 = smov (%p50_p0, %s48_s6), 0 }
  0x17   : > { %945 = sst [smem:[#allocation18_spill]] %s970_s6  ;;  %p775_p4 = por %p65_p2, %p64_p1 }
  0x18   : > { %p779_p5 = scmp.eq.s32.totalorder %s370_s30, 0  ;;  %s52_s10 = ssub.s32 %s675_s28, %s970_s6 }
  0x19   : > { %s80_s11 = sld [smem:[#allocation3 + %s675_s28]]  ;;  %p55_p6 = scmp.eq.s32.totalorder %s52_s10, 0 }
  0x1a   : > { %p791_p7 = por %p779_p5, %p70_p3  ;;  %s81_s13 = sld [smem:[#allocation3 + %s970_s6]] }
  0x1b   : > { %p126_p8 = scmp.eq.s32.totalorder %s370_s30, 1  ;;  %p132_p10 = scmp.eq.s32.totalorder %s371_s5, 1 }
  0x1c   : > { %s797_s14 = scalar_select %p55_p6, %s667_s26, %s57_s7  }
  0x1d   : > { %p802_p9 = por %p126_p8, %p64_p1  ;;  %p940_p12 = scmp.lt.s32.totalorder %s679_s29, 2 }
  0x1e   : > { %949 = sst [smem:[#allocation19_spill]] %s797_s14  ;;  %p811_p13 = por %p132_p10, %p70_p3 }
  0x1f   : > { %s152_s17 = sand.u32 1, %s667_s26   ;;  %s375_s19 = sshll.u32 %s675_s28, 3 }
  0x20   : > { %s374_s18 = sshll.u32 %s152_s17, 3  ;;  %s952_s2 = sld [smem:[#allocation20_spill]] }
  0x21   : > { %s156_s30 = scalar_lea.vmem [#allocation5], %s374_s18  ;;  %p395_p0 = pnand %p940_p12, %p775_p4 }
  0x22   : > { %s165_s5 = sshll.u32 %s156_s30, 4  ;;  %p378_p1 = scmp.ge.s32.totalorder %s679_s29, 1  ;;  %s166_s5 = int_to_ptr.vmem [resolvable:$true] %s165_s5 }
  0x23   : > { %p191_p3 = scmp.lt.s32.totalorder %s679_s29, 3  ;;  %s153_s10 = scalar_lea.sflag [#allocation6], %s152_s17 }
  0x24   : > { %s87_s20 = sadd.s32 1, %s655_s1  ;;  %p94_p10 = scmp.ne.s32.totalorder %s655_s1, %s651_s23 }
  0x25   : > { %p826_p6 = pnand %p378_p1, %p191_p3  ;;  %p100_p11 = scmp.ne.s32.totalorder %s651_s23, %s647_s0 }
  0x26   : > { %s161_s22 = scalar_lea.hbm %s952_s2, %s375_s19  ;;  %s82_s19 = ssub.s32 %s80_s11, %s81_s13 }
  0x27   : > { %s163_s7 = sshll.u32 %s161_s22, 4  ;;  %p85_p8 = scmp.eq.s32.totalorder %s82_s19, 0  ;;  %s164_s7 = int_to_ptr.hbm [resolvable:$true] %s163_s7 }
  0x28   : > { %397 = dma.hbm_to_vmem [thread:$0]  (!%p395_p0), %s164_s7, 128, %s166_s5, %s153_s10  }
  0x29   : > { %s172_s8 = sand.u32 1, %s655_s1   ;;  %p96_p4 = por %p94_p10, %p65_p2 }
  0x2a   : > { %s837_s21 = scalar_select %p85_p8, %s655_s1, %s87_s20  }
  0x2b   : > { %p843_p12 = por %p100_p11, %p779_p5  ;;  %s376_s22 = sshll.u32 %s172_s8, 3 }
  0x2c   : > { %p955_p0 = scmp.lt.s32.totalorder %s679_s29, 2  ;;  %s176_s5 = scalar_lea.vmem [#allocation8], %s376_s22 }
  0x2d   : > { %s387_s11 = scalar_select %p96_p4, [#allocation3], [#allocation11] }
  0x2e   : > { %p849_p1 = pnand %p955_p0, %p96_p4  ;;  %p957_p3 = pmov %p955_p0 }
  0x2f   : > { %s388_s13 = scalar_select %p96_p4, %s675_s28, 0 }
  0x30   : > { %s972_s11 = smov (!%p957_p3, %s387_s11), [#allocation12]  ;;  %p958_p8 = pmov %p955_p0 }
  0x31   : > { %s186_s9 = sshll.u32 %s176_s5, 4  ;;  %s173_s6 = scalar_lea.sflag [#allocation9], %s172_s8  ;;  %s187_s9 = int_to_ptr.vmem [resolvable:$true] %s186_s9 }
  0x32   : > { %s974_s13 = smov (!%p958_p8, %s388_s13), 0  ;;  %p541_p5 = pneg %p849_p1 }
  0x33   : > { %s177_s0 = sld [smem:[%s972_s11 + %s974_s13]]  ;;  %s544_s13 = scalar_lea.hbm %s937_s3, 16 }
  0x39   : > { %s377_s7 = sshll.u32 %s177_s0, 3 }
  0x3a   : > { %s182_s20 = scalar_lea.hbm %s937_s3, %s377_s7 }
  0x3b   : > { %s184_s2 = sshll.u32 %s182_s20, 4  ;;  %s185_s2 = int_to_ptr.hbm [resolvable:$true] %s184_s2 }
  0x3c   : > { %s537_s14 = sshra.s32 %s185_s2, 4  ;;  %s538_s14 = int_to_ptr.hbm [resolvable:$true] %s537_s14 }
  0x3d   : > { %s539_s28 = scalar_lea.hbm %s538_s14, 8  ;;  %p545_p4 = scmp.lt.s32.totalorder %s538_s14, %s937_s3 }
  0x3e   : > { %p540_p2 = scmp.ne.s32.totalorder %s538_s14, %s539_s28  ;;  %p546_p0 = scmp.lt.s32.totalorder %s544_s13, %s539_s28 }
  0x40   : > { %p542_p11 = pnand %p541_p5, %p540_p2  ;;  %p547_p3 = por %p546_p0, %p545_p4 }
  0x42   : > { %p543_p10 = pneg %p542_p11 }
  0x44   : > { %p548_p8 = pnand %p547_p3, %p543_p10 }
  0x46   : > { %551 = shalt.err (!%p548_p8)
}
  0x47   : > { %402 = dma.hbm_to_vmem [thread:$0]  (!%p849_p1), %s185_s2, 128, %s187_s9, %s173_s6  }
  0x48   : > { %195 = sbr.rel (%p826_p6) target bundleno = 98 (0x62), region = 28  ;;  %s874_s8 = sand.u32 (!%p826_p6), 1, %s663_s25  }
  0x49   : > { %s379_s7 = sshll.u32 (!%p826_p6), %s874_s8, 3  ;;  %s198_s10 = scalar_lea.sflag (!%p826_p6), [#allocation6], %s874_s8 }
  0x4a   : > { %s201_s19 = scalar_lea.vmem (!%p826_p6), [#allocation5], %s379_s7 }
  0x4d   : > { %634 = dma.done.wait (%p791_p7), %s198_s10, 128  }
  0x4e   : > { %636 = vsyncadd (%p791_p7), %s198_s10, 4294967168  ;;  %s207_s2 = sand.u32 1, %s651_s23  }
  0x4f   : > { %s380_s28 = sshll.u32 %s207_s2, 3  ;;  %s208_s6 = scalar_lea.sflag [#allocation9], %s207_s2 }
  0x50   : > { %s211_s14 = scalar_lea.vmem [#allocation8], %s380_s28 }
  0x51   : > { %638 = dma.done.wait (%p843_p12), %s208_s6, 128  }
  0x52   : > { %640 = vsyncadd (%p843_p12), %s208_s6, 4294967168  ;;  %s239_s18 = sld [smem:[#allocation4 + %s671_s27]]  ;;  %s383_s30 = sshll.u32 %s671_s27, 3  ;;  %v241_v0 = vld [vmem:[%s201_s19] sm:$0xff]  ;;  %v244_v2 = vld [vmem:[%s211_s14] sm:$0xff] }
  0x53   : > { %s261_s12 = scalar_lea.hbm %s938_s4, %s383_s30  ;;  %s237_s22 = scalar_lea.vmem [#allocation10], %s379_s7 }
  0x54   : > { %s263_s13 = sshll.u32 %s237_s22, 4  ;;  %s265_s17 = sshll.u32 %s261_s12, 4  ;;  %s264_s13 = int_to_ptr.vmem [resolvable:$true] %s263_s13  ;;  %s266_s17 = int_to_ptr.hbm [resolvable:$true] %s265_s17 }
  0x55   : > { %s250_s27 = scalar_lea.sflag [#allocation7], %s874_s8  ;;  %s581_s0 = sshra.s32 %s266_s17, 4  ;;  %s582_s0 = int_to_ptr.hbm [resolvable:$true] %s581_s0 }
  0x56   : > { %s583_s5 = scalar_lea.hbm %s582_s0, 8  ;;  %s587_s2 = scalar_lea.hbm %s938_s4, 16 }
  0x57   : > { %p584_p7 = scmp.ne.s32.totalorder %s582_s0, %s583_s5  ;;  %p588_p1 = scmp.lt.s32.totalorder %s582_s0, %s938_s4 }
  0x58   : > { %s240_s11 = ssub.f32 1.0, %s239_s18  ;;  %v242_v1 = vstv %s239_s18  ;;  %p589_p2 = scmp.lt.s32.totalorder %s587_s2, %s583_s5 }
  0x59   : > { %v243_v3 = vmul.f32 %v242_v1, %v241_v0  ;;  %p585_p12 = pnand %p584_p7, %p802_p9 }
  0x5a   : > { %v245_v4 = vstv %s240_s11  ;;  %p590_p5 = por %p589_p2, %p588_p1 }
  0x5b   : > { %v246_v5 = vmul.f32 %v245_v4, %v244_v2  ;;  %p586_p6 = pneg %p585_p12 }
  0x5d   : > { %v247_v6 = vadd.f32 %v246_v5, %v243_v3  ;;  %p591_p11 = pnand %p590_p5, %p586_p6 }
  0x5f   : > { %248 = vst [vmem:[%s237_s22] sm:$0xff] %v247_v6 }
  0x60   : > { %594 = shalt.err (!%p591_p11)
}
  0x61   : > { %392 = dma.vmem_to_hbm [thread:$0]  (%p802_p9), %s264_s13, 128, %s266_s17, %s250_s27  }
  0x62 PF: > { %s277_s8 = sand.u32 1, %s659_s24   ;;  %p959_p10 = scmp.ge.s32.totalorder %s679_s29, 2 }
  0x63   : > { %s278_s6 = scalar_lea.sflag [#allocation7], %s277_s8 }
  0x64   : > { %p404_p4 = pnand %p959_p10, %p811_p13 }
  0x66   : > { %p405_p0 = pneg %p404_p4 }
  0x68   : > { %642 = dma.done.wait (%p405_p0), %s278_s6, 128  }
  0x69   : > { %644 = vsyncadd (%p405_p0), %s278_s6, 4294967168  ;;  %s36_s29 = sadd.s32 1, %s679_s29   ;;  %s960_s15 = sld [smem:[#allocation19_spill]] }
  0x6a   : > { %p33_p3 = scmp.ge.s32.totalorder %s36_s29, 4   ;;  %s961_s27 = sld [smem:[#allocation17_spill]] }
  0x6b   : > { %s962_s28 = sld [smem:[#allocation18_spill]]  ;;  %s963_s0 = smov %s651_s23 }
  0x6c   : > { %s964_s23 = smov %s655_s1  ;;  %s965_s1 = smov %s837_s21 }
  0x6d   : > { %s966_s24 = smov %s663_s25  ;;  %s967_s25 = smov %s667_s26 }
  0x6e   :  { %35 = sbr.rel (!%p33_p3) target bundleno = 18 (0x12), region = 86 }
  0x6f   : > { %s968_s26 = smov %s960_s15 }
  0x73   :  { %284 = vsyncpa [#allocation6], 1 }
  0x74   :  { %286 = vsyncpa [#allocation6 + $0x1], 1 }
  0x75   :  { %287 = vsyncpa [#allocation9], 1 }
  0x76   :  { %289 = vsyncpa [#allocation9 + $0x1], 1 }
  0x77   :  { %290 = vsyncpa [#allocation7], 1 }
  0x78   :  { %292 = vsyncpa [#allocation7 + $0x1], 1 }

</bundles_post_ra>
